<compile_context>
chip_gen: v7x
topology: tpu7x:2x2x1
jax: 0.10.0
libtpu: 0.0.40
codegen_flags: <defaults>
</compile_context>

<pallas_src>
import functools

import jax
import jax.numpy as jnp
from jax.experimental import pallas as pl
from jax.experimental.pallas import tpu as pltpu


def _round_up(x: int, m: int) -> int:
    return (x + m - 1) // m * m


def reward_head_kernel(x_ref, w1_ref, b1_ref, w2_ref, b2_ref, o_ref, *, compute_dtype):
    # x_ref:  [TM, H]        (one row-tile of the flattened [B*S, H] activations)
    # w1_ref: [H, H], b1_ref: [1, H]  (f32 bias)
    # w2_ref: [H, L], b2_ref: [1, L]  (f32 bias; L = n_labels, unpadded)
    # o_ref:  [TM, L]
    x = x_ref[...].astype(compute_dtype)        # cast (if any) inside the kernel
    h = jnp.dot(x, w1_ref[...], preferred_element_type=jnp.float32)
    h = h + b1_ref[...]                         # f32 bias, f32 accumulator
    h = jnp.tanh(h)                             # tanh in f32
    h = h.astype(w2_ref.dtype)                  # back to compute dtype for the MXU
    out = jnp.dot(h, w2_ref[...], preferred_element_type=jnp.float32)
    out = out + b2_ref[...]
    o_ref[...] = out.astype(o_ref.dtype)


def reward_head(hidden_states, w_dense, b_dense, w_out, b_out,
                *, tm: int = 2048, compute_dtype=None):
    """hidden_states: [B, S, H]; w_dense: [H, H] ([in, out], i.e. torch W.T);
    b_dense: [H]; w_out: [H, L]; b_out: [L]  ->  [B, S, L]"""
    B, S, H = hidden_states.shape
    L = w_out.shape[1]
    M = B * S
    out_dtype = hidden_states.dtype
    cdt = hidden_states.dtype if compute_dtype is None else jnp.dtype(compute_dtype)

    # ---- row-tile sizing ----------------------------------------------------
    # Sublane-packing multiple of the streamed input dtype (8 f32, 16 bf16, 32 int8).
    in_bytes = jnp.dtype(hidden_states.dtype).itemsize
    mult = max(8, 32 // in_bytes)
    tm = max(mult, min(tm, _round_up(M, mult)))
    # Keep grid >= 2 whenever M allows so v7x's two TensorCores both get work.
    if _round_up(M, mult) > mult:
        tm = min(tm, _round_up(pl.cdiv(M, 2), mult))
    tm = _round_up(tm, mult)
    grid = (pl.cdiv(M, tm),)   # ragged last tile handled by Pallas boundary masking

    # ---- operands (no extra HBM passes: reshape is a view, no pad, no x cast) -
    x2d = hidden_states.reshape(M, H)
    w1 = w_dense.astype(cdt)
    b1 = b_dense.reshape(1, H).astype(jnp.float32)
    w2 = w_out.astype(cdt)
    b2 = b_out.reshape(1, L).astype(jnp.float32)

    act_bytes = jnp.dtype(cdt).itemsize
    out_bytes = jnp.dtype(out_dtype).itemsize
    cost = pl.CostEstimate(
        flops=2 * M * H * (H + L),
        transcendentals=M * H,
        bytes_accessed=(M * H * in_bytes + M * L * out_bytes
                        + (H * H + H * L) * act_bytes + (H + L) * 4),
    )

    kernel = functools.partial(reward_head_kernel, compute_dtype=cdt)

    out2d = pl.pallas_call(
        kernel,
        out_shape=jax.ShapeDtypeStruct((M, L), out_dtype),
        grid_spec=pltpu.PrefetchScalarGridSpec(
            num_scalar_prefetch=0,
            grid=grid,
            in_specs=[
                pl.BlockSpec((tm, H), lambda i: (i, 0)),   # x row-tile (streamed)
                pl.BlockSpec((H, H), lambda i: (0, 0)),    # W1 (resident)
                pl.BlockSpec((1, H), lambda i: (0, 0)),    # b1 (resident)
                pl.BlockSpec((H, L), lambda i: (0, 0)),    # W2 (resident, unpadded)
                pl.BlockSpec((1, L), lambda i: (0, 0)),    # b2 (resident, unpadded)
            ],
            out_specs=pl.BlockSpec((tm, L), lambda i: (i, 0)),
        ),
        compiler_params=pltpu.CompilerParams(
            # Rows are independent -> parallel; lets v7x shard the grid across its 2 TCs.
            dimension_semantics=("parallel",),
        ),
        cost_estimate=cost,
    )(x2d, w1, b1, w2, b2)

    return out2d.reshape(B, S, L)


def _reference(hidden_states, w_dense, b_dense, w_out, b_out):
    B, S, H = hidden_states.shape
    L = w_out.shape[1]
    x = hidden_states.reshape(-1, H).astype(jnp.float32)
    h = jnp.tanh(x @ w_dense.astype(jnp.float32) + b_dense.astype(jnp.float32))
    y = h @ w_out.astype(jnp.float32) + b_out.astype(jnp.float32)
    return y.reshape(B, S, L)


if __name__ == "__main__":
    # Small config consistent with the module: hidden_size=32, n_labels=4.
    H, L = 32, 4

    key = jax.random.PRNGKey(0)
    k_x, k_w1, k_b1, k_w2, k_b2, k_x2 = jax.random.split(key, 6)

    # Deterministic parameter init (weights stored as [in, out], i.e. W.T of torch).
    w_dense = jax.random.normal(k_w1, (H, H), dtype=jnp.float32) * 0.05
    b_dense = jax.random.normal(k_b1, (H,), dtype=jnp.float32) * 0.05
    w_out = jax.random.normal(k_w2, (H, L), dtype=jnp.float32) * 0.05
    b_out = jax.random.normal(k_b2, (L,), dtype=jnp.float32) * 0.05

    # Case 1: f32 path, M divisible by the tile multiple.
    B, S = 2, 8
    x = jax.random.normal(k_x, (B, S, H), dtype=jnp.float32)
    out = jax.block_until_ready(reward_head(x, w_dense, b_dense, w_out, b_out))
    ref = _reference(x, w_dense, b_dense, w_out, b_out)
    assert out.shape == (B, S, L)
    assert jnp.allclose(out, ref, atol=1e-5, rtol=1e-5)

    # Case 2: ragged M (B*S not a multiple of the tile) exercises the masked
    # boundary-block path (no wrapper-side padding anymore).
    B2, S2 = 3, 5
    x2 = jax.random.normal(k_x2, (B2, S2, H), dtype=jnp.float32)
    out2 = jax.block_until_ready(reward_head(x2, w_dense, b_dense, w_out, b_out))
    ref2 = _reference(x2, w_dense, b_dense, w_out, b_out)
    assert out2.shape == (B2, S2, L)
    assert jnp.allclose(out2, ref2, atol=1e-5, rtol=1e-5)

    # Case 3: bf16 compute path — f32 activations stream in unchanged and are cast
    # to bf16 inside the kernel (no wrapper-side cast pass); f32 accumulation kept.
    out3 = jax.block_until_ready(
        reward_head(x, w_dense, b_dense, w_out, b_out, compute_dtype=jnp.bfloat16))
    assert out3.shape == (B, S, L)
    assert jnp.allclose(out3.astype(jnp.float32), ref, atol=5e-2, rtol=5e-2)

    print("KERNEL_OK")
</pallas_src>

<mosaic_0001>
module attributes {stable_mosaic.version = 11 : i64} {
  func.func @reward_head_kernel(%arg0: i32, %arg1: memref<8x32xf32, #tpu.memory_space<vmem>>, %arg2: memref<32x32xf32, #tpu.memory_space<vmem>>, %arg3: memref<1x32xf32, #tpu.memory_space<vmem>>, %arg4: memref<32x4xf32, #tpu.memory_space<vmem>>, %arg5: memref<1x4xf32, #tpu.memory_space<vmem>>, %arg6: memref<8x4xf32, #tpu.memory_space<vmem>>) attributes {dimension_semantics = [#tpu.dimension_semantics<parallel>], iteration_bounds = array<i64: 2>, scalar_prefetch = 0 : i64, scratch_operands = 0 : i64, tpu.core_type = #tpu.core_type<tc>, window_params = [{transform_indices = @transform_0, window_bounds = array<i64: 8, 32>}, {pipeline_mode = #tpu.pipeline_mode<synchronous>, transform_indices = @transform_1, window_bounds = array<i64: 32, 32>}, {pipeline_mode = #tpu.pipeline_mode<synchronous>, transform_indices = @transform_2, window_bounds = array<i64: 1, 32>}, {pipeline_mode = #tpu.pipeline_mode<synchronous>, transform_indices = @transform_3, window_bounds = array<i64: 32, 4>}, {pipeline_mode = #tpu.pipeline_mode<synchronous>, transform_indices = @transform_4, window_bounds = array<i64: 1, 4>}, {transform_indices = @transform_5, window_bounds = array<i64: 8, 4>}]} {
    %c0 = arith.constant 0 : index
    %c0_0 = arith.constant 0 : index
    %0 = vector.load %arg1[%c0, %c0_0] : memref<8x32xf32, #tpu.memory_space<vmem>>, vector<8x32xf32>
    %c0_1 = arith.constant 0 : index
    %c0_2 = arith.constant 0 : index
    %1 = vector.load %arg2[%c0_1, %c0_2] : memref<32x32xf32, #tpu.memory_space<vmem>>, vector<32x32xf32>
    %cst = arith.constant dense<0.000000e+00> : vector<8x32xf32>
    %2 = tpu.matmul %0, %1, %cst {dimension_numbers = #tpu.dot_dimension_numbers<[1], [0], [0], [1], [0, 0, 1, 1], [], []>} : vector<8x32xf32>, vector<32x32xf32>, vector<8x32xf32> -> vector<8x32xf32>
    %c0_3 = arith.constant 0 : index
    %c0_4 = arith.constant 0 : index
    %3 = vector.load %arg3[%c0_3, %c0_4] : memref<1x32xf32, #tpu.memory_space<vmem>>, vector<1x32xf32>
    %4 = vector.broadcast %3 : vector<1x32xf32> to vector<8x32xf32>
    %5 = arith.addf %2, %4 : vector<8x32xf32>
    %6 = math.tanh %5 : vector<8x32xf32>
    %c0_5 = arith.constant 0 : index
    %c0_6 = arith.constant 0 : index
    %7 = vector.load %arg4[%c0_5, %c0_6] : memref<32x4xf32, #tpu.memory_space<vmem>>, vector<32x4xf32>
    %cst_7 = arith.constant dense<0.000000e+00> : vector<8x4xf32>
    %8 = tpu.matmul %6, %7, %cst_7 {dimension_numbers = #tpu.dot_dimension_numbers<[1], [0], [0], [1], [0, 0, 1, 1], [], []>} : vector<8x32xf32>, vector<32x4xf32>, vector<8x4xf32> -> vector<8x4xf32>
    %c0_8 = arith.constant 0 : index
    %c0_9 = arith.constant 0 : index
    %9 = vector.load %arg5[%c0_8, %c0_9] : memref<1x4xf32, #tpu.memory_space<vmem>>, vector<1x4xf32>
    %10 = vector.broadcast %9 : vector<1x4xf32> to vector<8x4xf32>
    %11 = arith.addf %8, %10 : vector<8x4xf32>
    %c0_10 = arith.constant 0 : index
    %c0_11 = arith.constant 0 : index
    %12 = vector.load %arg6[%c0_10, %c0_11] : memref<8x4xf32, #tpu.memory_space<vmem>>, vector<8x4xf32>
    tpu.vector_store %arg6[%c0_10, %c0_11], %11 {strides = array<i32>} : memref<8x4xf32, #tpu.memory_space<vmem>>, vector<8x4xf32>,
    return
  }
  func.func @transform_0(%arg0: i32) -> (i32, i32) {
    %c0_i32 = arith.constant 0 : i32
    %c0_i32_0 = arith.constant 0 : i32
    return %arg0, %c0_i32 : i32, i32
  }
  func.func @transform_1(%arg0: i32) -> (i32, i32) {
    %c0_i32 = arith.constant 0 : i32
    %c0_i32_0 = arith.constant 0 : i32
    %c0_i32_1 = arith.constant 0 : i32
    return %c0_i32, %c0_i32_0 : i32, i32
  }
  func.func @transform_2(%arg0: i32) -> (i32, i32) {
    %c0_i32 = arith.constant 0 : i32
    %c0_i32_0 = arith.constant 0 : i32
    %c0_i32_1 = arith.constant 0 : i32
    return %c0_i32, %c0_i32_0 : i32, i32
  }
  func.func @transform_3(%arg0: i32) -> (i32, i32) {
    %c0_i32 = arith.constant 0 : i32
    %c0_i32_0 = arith.constant 0 : i32
    %c0_i32_1 = arith.constant 0 : i32
    return %c0_i32, %c0_i32_0 : i32, i32
  }
  func.func @transform_4(%arg0: i32) -> (i32, i32) {
    %c0_i32 = arith.constant 0 : i32
    %c0_i32_0 = arith.constant 0 : i32
    %c0_i32_1 = arith.constant 0 : i32
    return %c0_i32, %c0_i32_0 : i32, i32
  }
  func.func @transform_5(%arg0: i32) -> (i32, i32) {
    %c0_i32 = arith.constant 0 : i32
    %c0_i32_0 = arith.constant 0 : i32
    return %arg0, %c0_i32 : i32, i32
  }
}

</mosaic_0001>

<bundles_post_ra>
// kernel: tpu_custom_call.1
= control target key start
LH: loop header
LB: loop body
LE: loop exit
PB: predicated region body
PF: predicated region fallthrough
CT: control target
= control target key end

     0   :  { %10 = vsyncpa [#allocation3], 0  ;;  %s819_s0 = inlined_call_operand.hbm [shape: f32[16,32], index: 0, kind: input, shape index: {}]   ;;  %s820_s1 = inlined_call_operand.vmem [shape: f32[32,32], index: 1, kind: input, shape index: {}]   ;;  %s821_s2 = inlined_call_operand.vmem [shape: f32[1,32], index: 2, kind: input, shape index: {}]   ;;  %s822_s3 = inlined_call_operand.vmem [shape: f32[32,4], index: 3, kind: input, shape index: {}]   ;;  %s823_s4 = inlined_call_operand.vmem [shape: f32[1,4], index: 4, kind: input, shape index: {}]   ;;  %s824_s5 = inlined_call_operand.vmem [shape: f32[16,4], index: 5, kind: output, shape index: {}]  }
   0x1   :  { %12 = vsyncpa [#allocation3 + $0x1], 0  ;;  %s680_s18 = smov 0   ;;  %s682_s19 = smov 0  }
   0x2   :  { %s684_s20 = smov 0   ;;  %s686_s21 = smov 0  }
   0x3 LB: > { %s699_s22 = sadd.s32 4294967295, %s644_s21   ;;  %s702_s23 = sadd.s32 1, %s644_s21   ;;  %s644_s21 = sphi %s686_s21, %s832_s21   ;;  %s640_s20 = sphi %s684_s20, %s831_s20   ;;  %s636_s19 = sphi %s682_s19, %s830_s19   ;;  %s632_s18 = sphi %s680_s18, %s829_s18  }
   0x4   : > { %s22_s24 = ssub.s32 %s644_s21, %s702_s23  ;;  %s25_s25 = sadd.s32 1, %s640_s20 }
   0x5   : > { %p23_p0 = scmp.eq.s32.totalorder %s22_s24, 0  ;;  %p32_p1 = scmp.ne.s32.totalorder %s640_s20, %s636_s19 }
   0x6   : > { %p33_p2 = scmp.eq.s32.totalorder %s644_s21, 0  ;;  %p38_p3 = scmp.ne.s32.totalorder %s636_s19, %s632_s18 }
   0x7   : > { %s712_s26 = scalar_select %p23_p0, %s640_s20, %s25_s25  }
   0x8   : > { %p34_p4 = por %p33_p2, %p32_p1  ;;  %p39_p5 = scmp.eq.s32.totalorder %s699_s22, 0 }
   0x9   : > { %p542_p6 = scmp.lt.s32.totalorder %s644_s21, 2  ;;  %s184_s28 = sand.u32 1, %s640_s20  }
   0xa   : > { %p716_p7 = por %p39_p5, %p38_p3  ;;  %s481_s29 = sshll.u32 %s184_s28, 3 }
   0xb   : > { %s482_s30 = sshll.u32 %s644_s21, 7  ;;  %s188_s9 = scalar_lea.vmem [#allocation2], %s481_s29 }
   0xc   : > { %s725_s8 = scalar_lea.hbm %s819_s0, %s482_s30  ;;  %s195_s10 = sshll.u32 %s188_s9, 4  ;;  %s727_s10 = int_to_ptr.vmem [resolvable:$true] %s195_s10 }
   0xd   : > { %p729_p8 = pnand %p542_p6, %p34_p4  ;;  %s185_s12 = scalar_lea.sflag [#allocation3], %s184_s28 }
   0xe   : > { %s580_s13 = scalar_lea.hbm %s725_s8, 128  ;;  %s585_s16 = scalar_lea.hbm %s819_s0, 256 }
   0xf   : > { %p581_p11 = scmp.ne.s32.totalorder %s725_s8, %s580_s13  ;;  %p582_p12 = pneg %p729_p8 }
  0x10   : > { %p586_p1 = scmp.lt.u32.totalorder %s725_s8, %s819_s0  ;;  %p587_p2 = scmp.lt.u32.totalorder %s585_s16, %s580_s13 }
  0x11   : > { %p583_p13 = pnand %p582_p12, %p581_p11  ;;  %p589_p4 = scmp.lt.u32.totalorder %s580_s13, %s725_s8 }
  0x12   : > { %p588_p3 = por %p587_p2, %p586_p1 }
  0x13   : > { %p584_p0 = pneg %p583_p13 }
  0x14   : > { %p590_p5 = por %p589_p4, %p588_p3 }
  0x16   : > { %p591_p6 = pnand %p590_p5, %p584_p0 }
  0x18   : > { %594 = shalt.err (!%p591_p6)
}
  0x19   : > { %s595_s24 = scalar_lea.vmem %s727_s10, 128  ;;  %s646_s25 = smov [#allocation2]  }
  0x1a   : > { %p596_p11 = scmp.ne.s32.totalorder %s727_s10, %s595_s24  ;;  %s600_s28 = sshll.u32 %s646_s25, 4  ;;  %s601_s28 = int_to_ptr.vmem [resolvable:$false] %s600_s28 }
  0x1b   : > { %s602_s29 = scalar_lea.vmem %s601_s28, 256  ;;  %p603_p10 = scmp.lt.s32.totalorder %s727_s10, %s601_s28 }
  0x1c   : > { %p598_p13 = pnand %p596_p11, %p582_p12  ;;  %p604_p1 = scmp.lt.s32.totalorder %s602_s29, %s595_s24 }
  0x1e   : > { %p599_p9 = pneg %p598_p13  ;;  %p605_p2 = por %p604_p1, %p603_p10 }
  0x20   : > { %p606_p3 = pnand %p605_p2, %p599_p9 }
  0x22   : > { %609 = shalt.err (!%p606_p3)
}
  0x23   : > { %541 = dma.hbm_to_vmem [thread:$0]  (!%p729_p8), %s725_s8, 128, %s727_s10, %s185_s12  }
  0x24   : > { %p827_p0 = scmp.lt.s32.totalorder %s644_s21, 3  ;;  %p828_p4 = scmp.ge.s32.totalorder %s644_s21, 1 }
  0x26   : > { %p201_p12 = pnand %p828_p4, %p827_p0 }
  0x27   : > { %s206_s30 = sand.u32 (!%p201_p12), 1, %s636_s19  }
  0x28   : > { %204 = sbr.rel (%p201_p12) target bundleno = 498 (0x1f2), region = 40  ;;  %s484_s6 = sshll.u32 (!%p201_p12), %s206_s30, 3 }
  0x29   : > { %s207_s7 = scalar_lea.sflag (!%p201_p12), [#allocation3], %s206_s30  ;;  %s210_s9 = scalar_lea.vmem (!%p201_p12), [#allocation2], %s484_s6 }
  0x2f   : > { %627 = dma.done.wait (%p716_p7), %s207_s7, 128  }
  0x30   : > { %629 = vsyncadd (%p716_p7), %s207_s7, 4294967168  ;;  %v647_v0 = vmov 0.0|0.0   ;;  %vm648_vm0 = vmmov 0   ;;  %v649_v1 = vmov 0.0   ;;  %v241_v2 = vld [vmem:[%s820_s1] sm:$0xff]  ;;  %v242_v3 = vld [vmem:[%s820_s1 + $0x8] sm:$0xff] }
  0x31   : > { %524 = vmatprep.subr.bf16.mxu0 %v647_v0  ;;  %510 = vmatprep.mubr.msk.f32.mxu0 %vm648_vm0, %v649_v1  ;;  %v243_v4 = vld [vmem:[%s820_s1 + $0x10] sm:$0xff]  ;;  %v525_v5 = vpack.c.bf16 %v242_v3, %v241_v2  ;;  %v244_v6 = vld [vmem:[%s820_s1 + $0x18] sm:$0xff]  ;;  %v240_v8 = vld [vmem:[%s210_s9] sm:$0xff]  ;;  %vm252_vm1 = vcmask 261120   ;;  %p236_p7 = scmp.lt.s32.totalorder %s699_s22, 1  ;;  %vm411_vm2 = vcmask 31744  }
  0x32   : > { %530 = vmatprep.subr.bf16.mxu1 %v647_v0  ;;  %521 = vmatprep.mubr.msk.f32.mxu1 %vm648_vm0, %v649_v1  ;;  %v528_v7 = vpack.c.bf16 %v244_v6, %v243_v4  ;;  %v327_v9 = vld [vmem:[%s822_s3] sm:$0xff]  ;;  %v328_v10 = vld [vmem:[%s822_s3 + $0x8] sm:$0xff]  ;;  %v329_v11 = vld [vmem:[%s822_s3 + $0x10] sm:$0xff] }
  0x33   : > { %526 = vmatpush3.bf16.msra.mxu0 %v525_v5  ;;  %v531_v12 = vpack.c.bf16 %v328_v10, %v327_v9  ;;  %v330_v13 = vld [vmem:[%s822_s3 + $0x18] sm:$0xff]  ;;  %v486_v15 = vld [vmem:[%s821_s2] ss:$0 sm:$0xff]  ;;  %s834_s22 = smov (!%p236_p7, %s699_s22), 1 }
  0x34   : > { %527 = vmatprep.subr.bf16.mxu0 %v647_v0  ;;  %v534_v14 = vpack.c.bf16 %v330_v13, %v329_v11  ;;  %s485_s7 = sshll.u32 %s834_s22, 3  ;;  %v488_v20 = vld [vmem:[%s823_s4] ss:$0 sm:$0xff] }
  0x35   : > { %532 = vmatpush3.bf16.msra.mxu1 %v531_v12  ;;  %s239_s11 = scalar_lea.vmem %s824_s5, %s485_s7 }
  0x36   : > { %533 = vmatprep.subr.bf16.mxu1 %v647_v0 }
  0x37   : > { %529 = vmatpush3.bf16.msra.mxu0 %v528_v7 }
  0x39   : > { %535 = vmatpush3.bf16.msra.mxu1 %v534_v14 }
  0x3a   : > { %511 = vmatmul.mubr.msk.f32.vlgmr.msra.gmra.mrb[0].mxu0 %vm252_vm1, %v240_v8 }
 0x10d   : > { %v322_v16 = vpop.f32.mrb[0].mxu0 }
 0x10e   : > { %v323_v17 = vadd.f32 %v486_v15, %v322_v16  ;;  %v512_v18 = vpop.f32.mrb[1].mxu0 }
 0x110   : > { %578 = vtanh.f32 %v323_v17 }
 0x11a   : > { %v579_v19 = vpop.eup %578 }
 0x11b   : > { %522 = vmatmul.mubr.msk.f32.vlgmr.msra.gmra.mrb[0].mxu1 %vm252_vm1, %v579_v19 }
 0x1ee   : > { %v407_v21 = vpop.f32.mrb[0].mxu1 }
 0x1ef   : > { %v408_v22 = vadd.f32 %v488_v20, %v407_v21  ;;  %v523_v23 = vpop.f32.mrb[1].mxu1 }
 0x1f1   : > { %412 = vst.msk [vmem:[%s239_s11] sm:$0xff] %vm411_vm2, %v408_v22 }
 0x1f2 PF: > { %p15_p8 = scmp.ge.s32.totalorder %s702_s23, 4   ;;  %s829_s18 = smov %s636_s19 }
 0x1f3   : > { %s830_s19 = smov %s640_s20  ;;  %s831_s20 = smov %s712_s26 }
 0x1f4   : > { %s832_s21 = smov %s702_s23  ;;  %17 = sbr.rel (!%p15_p8) target bundleno = 3 (0x3), region = 80 }
 0x1fb   :  { %432 = vsyncpa [#allocation3], 1 }
 0x1fc   :  { %434 = vsyncpa [#allocation3 + $0x1], 1 }

</bundles_post_ra>
